<compile_context>
chip_gen: v7x
topology: tpu7x:2x2x1
jax: 0.10.0
libtpu: 0.0.40
codegen_flags: <defaults>
</compile_context>

<pallas_src>
import functools

import jax
import jax.numpy as jnp
from jax.experimental import pallas as pl
from jax.experimental.pallas import tpu as pltpu


def _round_up(x, m):
    return (x + m - 1) // m * m


def _encoder_kernel(x_ref, *refs, num_layers, negative_slope):
    """Fused Encoder: chained Linear(+bias) -> LeakyReLU for every layer.

    refs layout: (w_0 .. w_{L-1}, b_0 .. b_{L-1}, o_ref)
      x_ref : (TB, P0)        f32 activation tile
      w_l   : (P_l, P_{l+1})  bf16, zero-padded, VMEM-resident
      b_l   : (1,  P_{l+1})   f32, zero-padded
      o_ref : (TB, P_L)       f32 output tile
    """
    w_refs = refs[:num_layers]
    b_refs = refs[num_layers:2 * num_layers]
    o_ref = refs[-1]

    h = x_ref[...]                                        # (TB, P0) f32
    for l in range(num_layers):                           # static unroll
        # bf16 operands -> MXU, accumulate in f32.
        y = jnp.dot(h.astype(jnp.bfloat16), w_refs[l][...],
                    preferred_element_type=jnp.float32) + b_refs[l][...]
        # Dropout(p=0.1) is identity at inference time.
        # TODO(synk): training-mode dropout (pltpu.prng_*) not implemented.
        h = jnp.maximum(y, negative_slope * y)            # LeakyReLU (f32)
    o_ref[...] = h.astype(o_ref.dtype)


def _vmem_budget_bytes():
    try:
        cap = pltpu.get_tpu_info().vmem_capacity_bytes
    except Exception:
        cap = 64 << 20            # conservative fallback: v7x per-TC VMEM
    return int(cap * 0.85)        # ~15% headroom for compiler scratch


def encoder_forward(x, params, negative_slope=0.01, batch_tile=512):
    """Encoder.forward: all FullyConnectedBlocks fused into one pallas_call."""
    B, din0 = x.shape
    L = len(params)
    dims = [din0] + [w.shape[1] for w, _ in params]
    for (w, b), din, dout in zip(params, dims[:-1], dims[1:]):
        assert w.shape == (din, dout) and b.reshape(-1).shape == (dout,)

    # Per-layer lane-dense padded feature widths (multiples of 128).
    p = [_round_up(d, 128) for d in dims]

    # Zero-pad each layer's weight/bias once (exact padding).
    w_pads, b_pads = [], []
    for l, ((w, b), din, dout) in enumerate(zip(params, dims[:-1], dims[1:])):
        wp = jnp.zeros((p[l], p[l + 1]), jnp.bfloat16)
        wp = wp.at[:din, :dout].set(w.astype(jnp.bfloat16))
        bp = jnp.zeros((1, p[l + 1]), jnp.float32)
        bp = bp.at[0, :dout].set(b.reshape(-1).astype(jnp.float32))
        w_pads.append(wp)
        b_pads.append(bp)

    weight_bytes = sum(wp.size * 2 for wp in w_pads)            # bf16
    bias_bytes = sum(8 * bp.shape[-1] * 4 for bp in b_pads)     # sublane-padded 1->8

    budget = _vmem_budget_bytes()
    margin = 2 << 20
    row_bytes = (p[0] + p[-1]) * 4                              # one x row + one out row (f32)

    avail = budget - (weight_bytes + bias_bytes) - margin
    if avail < 2 * 8 * row_bytes:
        # TODO(synk): layer-streaming fallback (grid over layers, (1,Pin,Pout)
        # double-buffered weight slabs, activation in VMEM scratch) for weight
        # stacks that do not fit resident in VMEM (v7x 64 MiB).
        raise NotImplementedError("Encoder weight stack does not fit VMEM")

    # Batch tile: multiple of 8, capped by the VMEM budget (double-buffered
    # x/out tiles) and by batch_tile; prefer >=2 grid steps so the "parallel"
    # axis shards across both v7x TensorCores.
    cap = max(8, (min(batch_tile, 1024) // 8) * 8)
    cap = min(cap, max(8, (avail // (2 * row_bytes)) // 8 * 8))
    b8 = _round_up(B, 8)
    if b8 <= 8:
        tb = 8
    else:
        tb = max(8, min(cap, _round_up(pl.cdiv(b8, 2), 8)))
    grid = (pl.cdiv(b8, tb),)
    b_pad = grid[0] * tb

    assert (weight_bytes + bias_bytes + 2 * tb * row_bytes + margin) <= budget

    # Pad only what is actually needed (no full zero copy when aligned).
    pad_rows, pad_cols = b_pad - B, p[0] - din0
    x_in = x.astype(jnp.float32)
    if pad_rows or pad_cols:
        x_in = jnp.pad(x_in, ((0, pad_rows), (0, pad_cols)))

    flops = 2 * b_pad * sum(p[l] * p[l + 1] for l in range(L))
    bytes_accessed = int(weight_bytes + bias_bytes + 4 * b_pad * (p[0] + p[-1]))
    cost = pl.CostEstimate(flops=int(flops), transcendentals=0,
                           bytes_accessed=bytes_accessed)

    kernel = functools.partial(_encoder_kernel, num_layers=L,
                               negative_slope=negative_slope)
    out_shape = jax.ShapeDtypeStruct((b_pad, p[-1]), jnp.float32)
    x_spec = pl.BlockSpec((tb, p[0]), lambda i: (i, 0))
    out_spec = pl.BlockSpec((tb, p[-1]), lambda i: (i, 0))

    def build(single_buffer_weights):
        pm = pl.Buffered(1) if single_buffer_weights else None
        w_specs = [pl.BlockSpec((p[l], p[l + 1]), lambda i: (0, 0),
                                pipeline_mode=pm) for l in range(L)]
        b_specs = [pl.BlockSpec((1, p[l + 1]), lambda i: (0, 0),
                                pipeline_mode=pm) for l in range(L)]
        return pl.pallas_call(
            kernel,
            out_shape=out_shape,
            grid=grid,
            in_specs=[x_spec] + w_specs + b_specs,
            out_specs=out_spec,
            compiler_params=pltpu.CompilerParams(
                dimension_semantics=("parallel",),
                vmem_limit_bytes=budget),
            cost_estimate=cost,
        )

    try:
        out_pad = build(True)(x_in, *w_pads, *b_pads)
    except Exception:
        # Fallback if single-buffering via pl.Buffered(1) is rejected.
        out_pad = build(False)(x_in, *w_pads, *b_pads)

    out = out_pad
    if b_pad != B or p[-1] != dims[-1]:
        out = out[:B, :dims[-1]]
    return out.astype(x.dtype)


def init_encoder_params(layer_shape, key):
    """Deterministic params matching nn.Linear shapes.

    PyTorch Linear weight is (out, in); we store the transpose (in, out) so
    the kernel computes x @ W directly (same math as x @ W.T + b)."""
    params = []
    for din, dout in zip(layer_shape[:-1], layer_shape[1:]):
        key, kw, kb = jax.random.split(key, 3)
        bound = 1.0 / jnp.sqrt(jnp.float32(din))
        w = jax.random.uniform(kw, (din, dout), jnp.float32, -bound, bound)
        b = jax.random.uniform(kb, (1, dout), jnp.float32, -bound, bound)
        params.append((w, b))
    return params


def encoder_reference(x, params, negative_slope=0.01,
                      compute_dtype=jnp.float32):
    """Pure-JAX reference (eval-mode PyTorch semantics)."""
    out = x.astype(jnp.float32)
    for w, b in params:
        y = jnp.dot(out.astype(compute_dtype), w.astype(compute_dtype),
                    preferred_element_type=jnp.float32) + b.reshape(-1)
        out = jnp.maximum(y, negative_slope * y)
    return out


if __name__ == "__main__":
    key = jax.random.PRNGKey(0)
    k_x, k_p = jax.random.split(key)

    batch = 8
    layer_shape = [32, 64, 128]            # Encoder(layer_shape=[32, 64, 128])

    x = jax.random.normal(k_x, (batch, layer_shape[0]), jnp.float32)
    params = init_encoder_params(layer_shape, k_p)

    out = jax.block_until_ready(encoder_forward(x, params))
    assert out.shape == (batch, layer_shape[-1])

    ref_bf16 = encoder_reference(x, params, compute_dtype=jnp.bfloat16)
    ref_f32 = encoder_reference(x, params, compute_dtype=jnp.float32)
    assert jnp.allclose(out, ref_bf16, atol=1e-3, rtol=1e-3), \
        "mismatch vs bf16-emulating reference"
    assert jnp.allclose(out, ref_f32, atol=5e-2, rtol=5e-2), \
        "mismatch vs f32 reference"

    print("KERNEL_OK")
</pallas_src>

<mosaic_0001>
module attributes {stable_mosaic.version = 11 : i64} {
  func.func @_encoder_kernel(%arg0: i32, %arg1: memref<8x128xf32, #tpu.memory_space<vmem>>, %arg2: memref<128x128xbf16, #tpu.memory_space<vmem>>, %arg3: memref<128x128xbf16, #tpu.memory_space<vmem>>, %arg4: memref<1x128xf32, #tpu.memory_space<vmem>>, %arg5: memref<1x128xf32, #tpu.memory_space<vmem>>, %arg6: memref<8x128xf32, #tpu.memory_space<vmem>>) attributes {dimension_semantics = [#tpu.dimension_semantics<parallel>], iteration_bounds = array<i64: 1>, scalar_prefetch = 0 : i64, scratch_operands = 0 : i64, tpu.core_type = #tpu.core_type<tc>, window_params = [{transform_indices = @transform_0, window_bounds = array<i64: 8, 128>}, {pipeline_mode = #tpu.pipeline_mode<synchronous>, transform_indices = @transform_1, window_bounds = array<i64: 128, 128>}, {pipeline_mode = #tpu.pipeline_mode<synchronous>, transform_indices = @transform_2, window_bounds = array<i64: 128, 128>}, {pipeline_mode = #tpu.pipeline_mode<synchronous>, transform_indices = @transform_3, window_bounds = array<i64: 1, 128>}, {pipeline_mode = #tpu.pipeline_mode<synchronous>, transform_indices = @transform_4, window_bounds = array<i64: 1, 128>}, {transform_indices = @transform_5, window_bounds = array<i64: 8, 128>}]} {
    %c0 = arith.constant 0 : index
    %c0_0 = arith.constant 0 : index
    %0 = vector.load %arg1[%c0, %c0_0] : memref<8x128xf32, #tpu.memory_space<vmem>>, vector<8x128xf32>
    %1 = arith.truncf %0 : vector<8x128xf32> to vector<8x128xbf16>
    %c0_1 = arith.constant 0 : index
    %c0_2 = arith.constant 0 : index
    %2 = vector.load %arg2[%c0_1, %c0_2] : memref<128x128xbf16, #tpu.memory_space<vmem>>, vector<128x128xbf16>
    %cst = arith.constant dense<0.000000e+00> : vector<8x128xf32>
    %3 = tpu.matmul %1, %2, %cst {dimension_numbers = #tpu.dot_dimension_numbers<[1], [0], [0], [1], [0, 0, 1, 1], [], []>} : vector<8x128xbf16>, vector<128x128xbf16>, vector<8x128xf32> -> vector<8x128xf32>
    %c0_3 = arith.constant 0 : index
    %c0_4 = arith.constant 0 : index
    %4 = vector.load %arg4[%c0_3, %c0_4] : memref<1x128xf32, #tpu.memory_space<vmem>>, vector<1x128xf32>
    %5 = vector.broadcast %4 : vector<1x128xf32> to vector<8x128xf32>
    %6 = arith.addf %3, %5 : vector<8x128xf32>
    %cst_5 = arith.constant 0.00999999977 : f32
    %7 = vector.broadcast %cst_5 : f32 to vector<8x128xf32>
    %8 = arith.mulf %7, %6 : vector<8x128xf32>
    %9 = arith.maximumf %6, %8 : vector<8x128xf32>
    %10 = arith.truncf %9 : vector<8x128xf32> to vector<8x128xbf16>
    %c0_6 = arith.constant 0 : index
    %c0_7 = arith.constant 0 : index
    %11 = vector.load %arg3[%c0_6, %c0_7] : memref<128x128xbf16, #tpu.memory_space<vmem>>, vector<128x128xbf16>
    %cst_8 = arith.constant dense<0.000000e+00> : vector<8x128xf32>
    %12 = tpu.matmul %10, %11, %cst_8 {dimension_numbers = #tpu.dot_dimension_numbers<[1], [0], [0], [1], [0, 0, 1, 1], [], []>} : vector<8x128xbf16>, vector<128x128xbf16>, vector<8x128xf32> -> vector<8x128xf32>
    %c0_9 = arith.constant 0 : index
    %c0_10 = arith.constant 0 : index
    %13 = vector.load %arg5[%c0_9, %c0_10] : memref<1x128xf32, #tpu.memory_space<vmem>>, vector<1x128xf32>
    %14 = vector.broadcast %13 : vector<1x128xf32> to vector<8x128xf32>
    %15 = arith.addf %12, %14 : vector<8x128xf32>
    %cst_11 = arith.constant 0.00999999977 : f32
    %16 = vector.broadcast %cst_11 : f32 to vector<8x128xf32>
    %17 = arith.mulf %16, %15 : vector<8x128xf32>
    %18 = arith.maximumf %15, %17 : vector<8x128xf32>
    %c0_12 = arith.constant 0 : index
    %c0_13 = arith.constant 0 : index
    %19 = vector.load %arg6[%c0_12, %c0_13] : memref<8x128xf32, #tpu.memory_space<vmem>>, vector<8x128xf32>
    tpu.vector_store %arg6[%c0_12, %c0_13], %18 {strides = array<i32>} : memref<8x128xf32, #tpu.memory_space<vmem>>, vector<8x128xf32>,
    return
  }
  func.func @transform_0(%arg0: i32) -> (i32, i32) {
    %c0_i32 = arith.constant 0 : i32
    %c0_i32_0 = arith.constant 0 : i32
    return %arg0, %c0_i32 : i32, i32
  }
  func.func @transform_1(%arg0: i32) -> (i32, i32) {
    %c0_i32 = arith.constant 0 : i32
    %c0_i32_0 = arith.constant 0 : i32
    %c0_i32_1 = arith.constant 0 : i32
    return %c0_i32, %c0_i32_0 : i32, i32
  }
  func.func @transform_2(%arg0: i32) -> (i32, i32) {
    %c0_i32 = arith.constant 0 : i32
    %c0_i32_0 = arith.constant 0 : i32
    %c0_i32_1 = arith.constant 0 : i32
    return %c0_i32, %c0_i32_0 : i32, i32
  }
  func.func @transform_3(%arg0: i32) -> (i32, i32) {
    %c0_i32 = arith.constant 0 : i32
    %c0_i32_0 = arith.constant 0 : i32
    %c0_i32_1 = arith.constant 0 : i32
    return %c0_i32, %c0_i32_0 : i32, i32
  }
  func.func @transform_4(%arg0: i32) -> (i32, i32) {
    %c0_i32 = arith.constant 0 : i32
    %c0_i32_0 = arith.constant 0 : i32
    %c0_i32_1 = arith.constant 0 : i32
    return %c0_i32, %c0_i32_0 : i32, i32
  }
  func.func @transform_5(%arg0: i32) -> (i32, i32) {
    %c0_i32 = arith.constant 0 : i32
    %c0_i32_0 = arith.constant 0 : i32
    return %arg0, %c0_i32 : i32, i32
  }
}

module attributes {stable_mosaic.version = 11 : i64} {
  func.func @_encoder_kernel(%arg0: i32, %arg1: memref<8x128xf32, #tpu.memory_space<vmem>>, %arg2: memref<128x128xbf16, #tpu.memory_space<vmem>>, %arg3: memref<128x128xbf16, #tpu.memory_space<vmem>>, %arg4: memref<1x128xf32, #tpu.memory_space<vmem>>, %arg5: memref<1x128xf32, #tpu.memory_space<vmem>>, %arg6: memref<8x128xf32, #tpu.memory_space<vmem>>) attributes {dimension_semantics = [#tpu.dimension_semantics<parallel>], iteration_bounds = array<i64: 1>, scalar_prefetch = 0 : i64, scratch_operands = 0 : i64, tpu.core_type = #tpu.core_type<tc>, window_params = [{transform_indices = @transform_0, window_bounds = array<i64: 8, 128>}, {pipeline_mode = #tpu.pipeline_mode<synchronous>, transform_indices = @transform_1, window_bounds = array<i64: 128, 128>}, {pipeline_mode = #tpu.pipeline_mode<synchronous>, transform_indices = @transform_2, window_bounds = array<i64: 128, 128>}, {pipeline_mode = #tpu.pipeline_mode<synchronous>, transform_indices = @transform_3, window_bounds = array<i64: 1, 128>}, {pipeline_mode = #tpu.pipeline_mode<synchronous>, transform_indices = @transform_4, window_bounds = array<i64: 1, 128>}, {transform_indices = @transform_5, window_bounds = array<i64: 8, 128>}]} {
    %c0 = arith.constant 0 : index
    %c0_0 = arith.constant 0 : index
    %0 = vector.load %arg1[%c0, %c0_0] : memref<8x128xf32, #tpu.memory_space<vmem>>, vector<8x128xf32>
    %1 = arith.truncf %0 : vector<8x128xf32> to vector<8x128xbf16>
    %c0_1 = arith.constant 0 : index
    %c0_2 = arith.constant 0 : index
    %2 = vector.load %arg2[%c0_1, %c0_2] : memref<128x128xbf16, #tpu.memory_space<vmem>>, vector<128x128xbf16>
    %cst = arith.constant dense<0.000000e+00> : vector<8x128xf32>
    %3 = tpu.matmul %1, %2, %cst {dimension_numbers = #tpu.dot_dimension_numbers<[1], [0], [0], [1], [0, 0, 1, 1], [], []>} : vector<8x128xbf16>, vector<128x128xbf16>, vector<8x128xf32> -> vector<8x128xf32>
    %c0_3 = arith.constant 0 : index
    %c0_4 = arith.constant 0 : index
    %4 = vector.load %arg4[%c0_3, %c0_4] : memref<1x128xf32, #tpu.memory_space<vmem>>, vector<1x128xf32>
    %5 = vector.broadcast %4 : vector<1x128xf32> to vector<8x128xf32>
    %6 = arith.addf %3, %5 : vector<8x128xf32>
    %cst_5 = arith.constant 0.00999999977 : f32
    %7 = vector.broadcast %cst_5 : f32 to vector<8x128xf32>
    %8 = arith.mulf %7, %6 : vector<8x128xf32>
    %9 = arith.maximumf %6, %8 : vector<8x128xf32>
    %10 = arith.truncf %9 : vector<8x128xf32> to vector<8x128xbf16>
    %c0_6 = arith.constant 0 : index
    %c0_7 = arith.constant 0 : index
    %11 = vector.load %arg3[%c0_6, %c0_7] : memref<128x128xbf16, #tpu.memory_space<vmem>>, vector<128x128xbf16>
    %cst_8 = arith.constant dense<0.000000e+00> : vector<8x128xf32>
    %12 = tpu.matmul %10, %11, %cst_8 {dimension_numbers = #tpu.dot_dimension_numbers<[1], [0], [0], [1], [0, 0, 1, 1], [], []>} : vector<8x128xbf16>, vector<128x128xbf16>, vector<8x128xf32> -> vector<8x128xf32>
    %c0_9 = arith.constant 0 : index
    %c0_10 = arith.constant 0 : index
    %13 = vector.load %arg5[%c0_9, %c0_10] : memref<1x128xf32, #tpu.memory_space<vmem>>, vector<1x128xf32>
    %14 = vector.broadcast %13 : vector<1x128xf32> to vector<8x128xf32>
    %15 = arith.addf %12, %14 : vector<8x128xf32>
    %cst_11 = arith.constant 0.00999999977 : f32
    %16 = vector.broadcast %cst_11 : f32 to vector<8x128xf32>
    %17 = arith.mulf %16, %15 : vector<8x128xf32>
    %18 = arith.maximumf %15, %17 : vector<8x128xf32>
    %c0_12 = arith.constant 0 : index
    %c0_13 = arith.constant 0 : index
    %19 = vector.load %arg6[%c0_12, %c0_13] : memref<8x128xf32, #tpu.memory_space<vmem>>, vector<8x128xf32>
    tpu.vector_store %arg6[%c0_12, %c0_13], %18 {strides = array<i32>} : memref<8x128xf32, #tpu.memory_space<vmem>>, vector<8x128xf32>,
    return
  }
  func.func @transform_0(%arg0: i32) -> (i32, i32) {
    %c0_i32 = arith.constant 0 : i32
    %c0_i32_0 = arith.constant 0 : i32
    return %arg0, %c0_i32 : i32, i32
  }
  func.func @transform_1(%arg0: i32) -> (i32, i32) {
    %c0_i32 = arith.constant 0 : i32
    %c0_i32_0 = arith.constant 0 : i32
    %c0_i32_1 = arith.constant 0 : i32
    return %c0_i32, %c0_i32_0 : i32, i32
  }
  func.func @transform_2(%arg0: i32) -> (i32, i32) {
    %c0_i32 = arith.constant 0 : i32
    %c0_i32_0 = arith.constant 0 : i32
    %c0_i32_1 = arith.constant 0 : i32
    return %c0_i32, %c0_i32_0 : i32, i32
  }
  func.func @transform_3(%arg0: i32) -> (i32, i32) {
    %c0_i32 = arith.constant 0 : i32
    %c0_i32_0 = arith.constant 0 : i32
    %c0_i32_1 = arith.constant 0 : i32
    return %c0_i32, %c0_i32_0 : i32, i32
  }
  func.func @transform_4(%arg0: i32) -> (i32, i32) {
    %c0_i32 = arith.constant 0 : i32
    %c0_i32_0 = arith.constant 0 : i32
    %c0_i32_1 = arith.constant 0 : i32
    return %c0_i32, %c0_i32_0 : i32, i32
  }
  func.func @transform_5(%arg0: i32) -> (i32, i32) {
    %c0_i32 = arith.constant 0 : i32
    %c0_i32_0 = arith.constant 0 : i32
    return %arg0, %c0_i32 : i32, i32
  }
}

</mosaic_0001>

<bundles_post_ra>
// kernel: tpu_custom_call.1
= control target key start
LH: loop header
LB: loop body
LE: loop exit
PB: predicated region body
PF: predicated region fallthrough
CT: control target
= control target key end

     0   :  { %10 = vsyncpa [#allocation3], 0  ;;  %s599_s0 = inlined_call_operand.hbm [shape: f32[8,128], index: 0, kind: input, shape index: {}]   ;;  %s600_s1 = inlined_call_operand.hbm [shape: bf16[128,128], index: 1, kind: input, shape index: {}]   ;;  %s601_s2 = inlined_call_operand.hbm [shape: bf16[128,128], index: 2, kind: input, shape index: {}]   ;;  %s602_s3 = inlined_call_operand.vmem [shape: f32[1,128], index: 3, kind: input, shape index: {}]   ;;  %s603_s4 = inlined_call_operand.vmem [shape: f32[1,128], index: 4, kind: input, shape index: {}]   ;;  %s604_s5 = inlined_call_operand.hbm [shape: f32[8,128], index: 5, kind: output, shape index: {}]  }
   0x1   :  { %11 = vsyncpa [#allocation6], 0 }
   0x2   :  { %12 = vsyncpa [#allocation4], 0  ;;  %s501_s18 = smov [#allocation5]   ;;  %s407_s22 = scalar_lea.hbm %s600_s1, 1024 }
   0x3   :  { %s28_s19 = sshll.u32 %s501_s18, 4  ;;  %p408_p0 = scmp.ne.s32.totalorder %s600_s1, %s407_s22  ;;  %s29_s19 = int_to_ptr.vmem [resolvable:$true] %s28_s19 }
   0x4   :  { %p411_p1 = scmp.lt.u32.totalorder %s407_s22, %s600_s1 }
   0x6   :  { %p413_p2 = pnand %p411_p1, %p408_p0 }
   0x8   :  { %416 = shalt.err (!%p413_p2)
}
   0x9   :  { %s417_s27 = scalar_lea.vmem %s29_s19, 1024  ;;  %p422_p4 = scmp.lt.s32.totalorder %s29_s19, %s29_s19 }
   0xa   :  { %p418_p3 = scmp.ne.s32.totalorder %s29_s19, %s417_s27  ;;  %p423_p5 = scmp.lt.s32.totalorder %s417_s27, %s417_s27 }
   0xc   :  { %p424_p6 = por %p423_p5, %p422_p4 }
   0xe   :  { %p425_p7 = pnand %p424_p6, %p418_p3 }
  0x10   :  { %428 = shalt.err (!%p425_p7)
}
  0x11   :  { %s502_s28 = smov 64   ;;  %s503_s29 = smov 4  }
  0x12   :  { %34 = dma.hbm_to_vmem [thread:$0]  %s600_s1, 1024, %s29_s19, [#allocation6], %s502_s28, %s502_s28, %s503_s29  }
  0x13   :  { %s504_s7 = smov [#allocation2]   ;;  %s505_s9 = smov [#allocation7]  }
  0x14   :  { %s19_s8 = sshll.u32 %s504_s7, 4  ;;  %s40_s10 = sshll.u32 %s505_s9, 4  ;;  %s20_s8 = int_to_ptr.vmem [resolvable:$true] %s19_s8  ;;  %s41_s10 = int_to_ptr.vmem [resolvable:$true] %s40_s10 }
  0x15   :  { %s429_s13 = scalar_lea.hbm %s599_s0, 128 }
  0x16   :  { %p430_p8 = scmp.ne.s32.totalorder %s599_s0, %s429_s13  ;;  %p433_p9 = scmp.lt.u32.totalorder %s429_s13, %s599_s0 }
  0x18   :  { %p435_p10 = pnand %p433_p9, %p430_p8 }
  0x1a   :  { %438 = shalt.err (!%p435_p10)
}
  0x1b   :  { %s439_s1 = scalar_lea.vmem %s20_s8, 128  ;;  %p444_p12 = scmp.lt.s32.totalorder %s20_s8, %s20_s8 }
  0x1c   :  { %p440_p11 = scmp.ne.s32.totalorder %s20_s8, %s439_s1  ;;  %p445_p13 = scmp.lt.s32.totalorder %s439_s1, %s439_s1 }
  0x1e   :  { %p446_p0 = por %p445_p13, %p444_p12 }
  0x20   :  { %p447_p1 = pnand %p446_p0, %p440_p11 }
  0x22   :  { %450 = shalt.err (!%p447_p1)
}
  0x23   :  { %22 = dma.hbm_to_vmem [thread:$0]  %s599_s0, 128, %s20_s8, [#allocation3]  }
  0x24   :  { %s451_s22 = scalar_lea.hbm %s601_s2, 1024 }
  0x25   :  { %p452_p2 = scmp.ne.s32.totalorder %s601_s2, %s451_s22  ;;  %p455_p3 = scmp.lt.u32.totalorder %s451_s22, %s601_s2 }
  0x27   :  { %p457_p4 = pnand %p455_p3, %p452_p2 }
  0x29   :  { %460 = shalt.err (!%p457_p4)
}
  0x2a   :  { %s461_s27 = scalar_lea.vmem %s41_s10, 1024  ;;  %p466_p6 = scmp.lt.s32.totalorder %s41_s10, %s41_s10 }
  0x2b   :  { %p462_p5 = scmp.ne.s32.totalorder %s41_s10, %s461_s27  ;;  %p467_p7 = scmp.lt.s32.totalorder %s461_s27, %s461_s27 }
  0x2d   :  { %p468_p8 = por %p467_p7, %p466_p6 }
  0x2f   :  { %p469_p9 = pnand %p468_p8, %p462_p5 }
  0x31   :  { %472 = shalt.err (!%p469_p9)
}
  0x32   :  { %46 = dma.hbm_to_vmem [thread:$0]  %s601_s2, 1024, %s41_s10, [#allocation6], %s502_s28, %s502_s28, %s503_s29  }
  0x33   :  { %495 = dma.done.wait [#allocation3], 128  }
  0x34   :  { %496 = vsyncadd [#allocation3], 4294967168 }
  0x35   :  { %497 = dma.done.wait [#allocation6], 2048  }
  0x36   :  { %498 = vsyncadd [#allocation6], 4294965248  ;;  %v506_v0 = vmov 0.0   ;;  %vm507_vm0 = vmmov 0   ;;  %v391_v1 = vld [vmem:[#allocation5] sm:$0xff]   ;;  %v392_v2 = vld [vmem:[#allocation5 + $0x8] sm:$0xff]  }
  0x37   :  { %343 = vmatprep.subr.bf16.mxu0 %v506_v0  ;;  %359 = vmatprep.mubr.msk.bf16.mxu0 %vm507_vm0, %v506_v0  ;;  %v393_v3 = vld [vmem:[#allocation5 + $0x10] sm:$0xff]   ;;  %v399_v4 = vld [vmem:[#allocation7] sm:$0xff]   ;;  %v394_v5 = vld [vmem:[#allocation5 + $0x18] sm:$0xff]   ;;  %s508_s7 = smov [#allocation8]  }
  0x38   :  { %363 = vmatprep.subr.bf16.mxu1 %v506_v0  ;;  %379 = vmatprep.mubr.msk.bf16.mxu1 %vm507_vm0, %v506_v0  ;;  %v400_v6 = vld [vmem:[#allocation7 + $0x8] sm:$0xff]   ;;  %v395_v7 = vld [vmem:[#allocation5 + $0x20] sm:$0xff]   ;;  %v401_v8 = vld [vmem:[#allocation7 + $0x10] sm:$0xff]   ;;  %s297_s8 = sshll.u32 %s508_s7, 4  ;;  %s298_s8 = int_to_ptr.vmem [resolvable:$true] %s297_s8 }
  0x39   :  { %344 = vmatpush3.bf16.msra.mxu0 %v391_v1  ;;  %364 = vmatpush3.bf16.msra.mxu1 %v399_v4  ;;  %v396_v9 = vld [vmem:[#allocation5 + $0x28] sm:$0xff]   ;;  %v402_v10 = vld [vmem:[#allocation7 + $0x18] sm:$0xff]   ;;  %v397_v11 = vld [vmem:[#allocation5 + $0x30] sm:$0xff]   ;;  %p478_p11 = scmp.lt.s32.totalorder %s298_s8, %s298_s8 }
  0x3a   :  { %345 = vmatprep.subr.bf16.mxu0 %v506_v0  ;;  %365 = vmatprep.subr.bf16.mxu1 %v506_v0  ;;  %v403_v12 = vld [vmem:[#allocation7 + $0x20] sm:$0xff]   ;;  %v398_v13 = vld [vmem:[#allocation5 + $0x38] sm:$0xff]   ;;  %v404_v15 = vld [vmem:[#allocation7 + $0x28] sm:$0xff]  }
  0x3b   :  { %v61_v14 = vld [vmem:[#allocation2] sm:$0xff]  ;;  %v405_v17 = vld [vmem:[#allocation7 + $0x30] sm:$0xff]  }
  0x3c   :  { %v62_v16 = vpack.c.bf16 %v61_v14, %v61_v14  ;;  %v406_v18 = vld [vmem:[#allocation7 + $0x38] sm:$0xff]  }
  0x3d   :  { %346 = vmatpush3.bf16.msra.mxu0 %v392_v2  ;;  %366 = vmatpush3.bf16.msra.mxu1 %v400_v6  ;;  %v307_v19 = vld [vmem:[%s602_s3] ss:$0 sm:$0xff]  ;;  %s473_s3 = scalar_lea.vmem %s298_s8, 128 }
  0x3e   :  { %347 = vmatprep.subr.bf16.mxu0 %v506_v0  ;;  %367 = vmatprep.subr.bf16.mxu1 %v506_v0  ;;  %v316_v28 = vld [vmem:[%s603_s4] ss:$0 sm:$0xff]  ;;  %p474_p10 = scmp.ne.s32.totalorder %s298_s8, %s473_s3  ;;  %p479_p12 = scmp.lt.s32.totalorder %s473_s3, %s473_s3 }
  0x40   :  { %p480_p13 = por %p479_p12, %p478_p11 }
  0x41   :  { %348 = vmatpush3.bf16.msra.mxu0 %v393_v3  ;;  %368 = vmatpush3.bf16.msra.mxu1 %v401_v8 }
  0x42   :  { %349 = vmatprep.subr.bf16.mxu0 %v506_v0  ;;  %369 = vmatprep.subr.bf16.mxu1 %v506_v0  ;;  %p481_p0 = pnand %p480_p13, %p474_p10 }
  0x45   :  { %350 = vmatpush3.bf16.msra.mxu0 %v394_v5  ;;  %370 = vmatpush3.bf16.msra.mxu1 %v402_v10 }
  0x46   :  { %351 = vmatprep.subr.bf16.mxu0 %v506_v0  ;;  %371 = vmatprep.subr.bf16.mxu1 %v506_v0 }
  0x49   :  { %352 = vmatpush3.bf16.msra.mxu0 %v395_v7  ;;  %372 = vmatpush3.bf16.msra.mxu1 %v403_v12 }
  0x4a   :  { %353 = vmatprep.subr.bf16.mxu0 %v506_v0  ;;  %373 = vmatprep.subr.bf16.mxu1 %v506_v0 }
  0x4d   :  { %354 = vmatpush3.bf16.msra.mxu0 %v396_v9  ;;  %374 = vmatpush3.bf16.msra.mxu1 %v404_v15 }
  0x4e   :  { %355 = vmatprep.subr.bf16.mxu0 %v506_v0  ;;  %375 = vmatprep.subr.bf16.mxu1 %v506_v0 }
  0x51   :  { %356 = vmatpush3.bf16.msra.mxu0 %v397_v11  ;;  %376 = vmatpush3.bf16.msra.mxu1 %v405_v17 }
  0x52   :  { %357 = vmatprep.subr.bf16.mxu0 %v506_v0  ;;  %377 = vmatprep.subr.bf16.mxu1 %v506_v0 }
  0x55   :  { %358 = vmatpush3.bf16.msra.mxu0 %v398_v13  ;;  %378 = vmatpush3.bf16.msra.mxu1 %v406_v18 }
  0x58   :  { %360 = vmatmul.mubr.bf16.vlgmr.msra.gmra.mrb[0].mxu0 %v62_v16 }
 0x12b   :  { %v168_v20 = vpop.f32.mrb[0].mxu0 }
 0x12c   :  { %v169_v21 = vadd.f32 %v307_v19, %v168_v20  ;;  %v361_v22 = vpop.f32.mrb[1].mxu0 }
 0x12d   :  { %v171_v23 = vpop.f32.mrb[2].mxu0 }
 0x12e   :  { %v174_v24 = vmul.f32 0.01, %v169_v21  ;;  %v362_v25 = vpop.f32.mrb[3].mxu0 }
 0x130   :  { %v175_v26 = vmax.f32 %v169_v21, %v174_v24 }
 0x132   :  { %v176_v27 = vpack.c.bf16 %v175_v26, %v175_v26 }
 0x134   :  { %380 = vmatmul.mubr.bf16.vlgmr.msra.gmra.mrb[0].mxu1 %v176_v27 }
 0x207   :  { %v282_v29 = vpop.f32.mrb[0].mxu1 }
 0x208   :  { %v283_v30 = vadd.f32 %v316_v28, %v282_v29  ;;  %v381_v31 = vpop.f32.mrb[1].mxu1 }
 0x209   :  { %v285_v32 = vpop.f32.mrb[2].mxu1 }
 0x20a   :  { %v288_v33 = vmul.f32 0.01, %v283_v30  ;;  %v382_v34 = vpop.f32.mrb[3].mxu1 }
 0x20c   :  { %v289_v35 = vmax.f32 %v283_v30, %v288_v33 }
 0x20e   :  { %290 = vst [vmem:[#allocation8] sm:$0xff] %v289_v35 }
 0x20f   :  { %484 = shalt.err (!%p481_p0)
}
 0x210   :  { %s485_s10 = scalar_lea.hbm %s604_s5, 128 }
 0x211   :  { %p486_p1 = scmp.ne.s32.totalorder %s604_s5, %s485_s10  ;;  %p489_p2 = scmp.lt.u32.totalorder %s485_s10, %s604_s5 }
 0x213   :  { %p491_p3 = pnand %p489_p2, %p486_p1 }
 0x215   :  { %494 = shalt.err (!%p491_p3)
}
 0x216   :  { %300 = dma.vmem_to_hbm [thread:$0]  %s298_s8, 128, %s604_s5, [#allocation4]  }
 0x217   :  { %499 = dma.done.wait [#allocation4], 128  }
 0x218   :  { %500 = vsyncadd [#allocation4], 4294967168 }
 0x219   :  { %304 = vsyncpa [#allocation3], 1 }
 0x21a   :  { %305 = vsyncpa [#allocation6], 1 }
 0x21b   :  { %306 = vsyncpa [#allocation4], 1 }

// kernel: tpu_custom_call.1
= control target key start
LH: loop header
LB: loop body
LE: loop exit
PB: predicated region body
PF: predicated region fallthrough
CT: control target
= control target key end

     0   :  { %10 = vsyncpa [#allocation3], 0  ;;  %s599_s0 = inlined_call_operand.hbm [shape: f32[8,128], index: 0, kind: input, shape index: {}]   ;;  %s600_s1 = inlined_call_operand.hbm [shape: bf16[128,128], index: 1, kind: input, shape index: {}]   ;;  %s601_s2 = inlined_call_operand.hbm [shape: bf16[128,128], index: 2, kind: input, shape index: {}]   ;;  %s602_s3 = inlined_call_operand.vmem [shape: f32[1,128], index: 3, kind: input, shape index: {}]   ;;  %s603_s4 = inlined_call_operand.vmem [shape: f32[1,128], index: 4, kind: input, shape index: {}]   ;;  %s604_s5 = inlined_call_operand.hbm [shape: f32[8,128], index: 5, kind: output, shape index: {}]  }
   0x1   :  { %11 = vsyncpa [#allocation6], 0 }
   0x2   :  { %12 = vsyncpa [#allocation4], 0  ;;  %s501_s18 = smov [#allocation5]   ;;  %s407_s22 = scalar_lea.hbm %s600_s1, 1024 }
   0x3   :  { %s28_s19 = sshll.u32 %s501_s18, 4  ;;  %p408_p0 = scmp.ne.s32.totalorder %s600_s1, %s407_s22  ;;  %s29_s19 = int_to_ptr.vmem [resolvable:$true] %s28_s19 }
   0x4   :  { %p411_p1 = scmp.lt.u32.totalorder %s407_s22, %s600_s1 }
   0x6   :  { %p413_p2 = pnand %p411_p1, %p408_p0 }
   0x8   :  { %416 = shalt.err (!%p413_p2)
}
   0x9   :  { %s417_s27 = scalar_lea.vmem %s29_s19, 1024  ;;  %p422_p4 = scmp.lt.s32.totalorder %s29_s19, %s29_s19 }
   0xa   :  { %p418_p3 = scmp.ne.s32.totalorder %s29_s19, %s417_s27  ;;  %p423_p5 = scmp.lt.s32.totalorder %s417_s27, %s417_s27 }
   0xc   :  { %p424_p6 = por %p423_p5, %p422_p4 }
   0xe   :  { %p425_p7 = pnand %p424_p6, %p418_p3 }
  0x10   :  { %428 = shalt.err (!%p425_p7)
}
  0x11   :  { %s502_s28 = smov 64   ;;  %s503_s29 = smov 4  }
  0x12   :  { %34 = dma.hbm_to_vmem [thread:$0]  %s600_s1, 1024, %s29_s19, [#allocation6], %s502_s28, %s502_s28, %s503_s29  }
  0x13   :  { %s504_s7 = smov [#allocation2]   ;;  %s505_s9 = smov [#allocation7]  }
  0x14   :  { %s19_s8 = sshll.u32 %s504_s7, 4  ;;  %s40_s10 = sshll.u32 %s505_s9, 4  ;;  %s20_s8 = int_to_ptr.vmem [resolvable:$true] %s19_s8  ;;  %s41_s10 = int_to_ptr.vmem [resolvable:$true] %s40_s10 }
  0x15   :  { %s429_s13 = scalar_lea.hbm %s599_s0, 128 }
  0x16   :  { %p430_p8 = scmp.ne.s32.totalorder %s599_s0, %s429_s13  ;;  %p433_p9 = scmp.lt.u32.totalorder %s429_s13, %s599_s0 }
  0x18   :  { %p435_p10 = pnand %p433_p9, %p430_p8 }
  0x1a   :  { %438 = shalt.err (!%p435_p10)
}
  0x1b   :  { %s439_s1 = scalar_lea.vmem %s20_s8, 128  ;;  %p444_p12 = scmp.lt.s32.totalorder %s20_s8, %s20_s8 }
  0x1c   :  { %p440_p11 = scmp.ne.s32.totalorder %s20_s8, %s439_s1  ;;  %p445_p13 = scmp.lt.s32.totalorder %s439_s1, %s439_s1 }
  0x1e   :  { %p446_p0 = por %p445_p13, %p444_p12 }
  0x20   :  { %p447_p1 = pnand %p446_p0, %p440_p11 }
  0x22   :  { %450 = shalt.err (!%p447_p1)
}
  0x23   :  { %22 = dma.hbm_to_vmem [thread:$0]  %s599_s0, 128, %s20_s8, [#allocation3]  }
  0x24   :  { %s451_s22 = scalar_lea.hbm %s601_s2, 1024 }
  0x25   :  { %p452_p2 = scmp.ne.s32.totalorder %s601_s2, %s451_s22  ;;  %p455_p3 = scmp.lt.u32.totalorder %s451_s22, %s601_s2 }
  0x27   :  { %p457_p4 = pnand %p455_p3, %p452_p2 }
  0x29   :  { %460 = shalt.err (!%p457_p4)
}
  0x2a   :  { %s461_s27 = scalar_lea.vmem %s41_s10, 1024  ;;  %p466_p6 = scmp.lt.s32.totalorder %s41_s10, %s41_s10 }
  0x2b   :  { %p462_p5 = scmp.ne.s32.totalorder %s41_s10, %s461_s27  ;;  %p467_p7 = scmp.lt.s32.totalorder %s461_s27, %s461_s27 }
  0x2d   :  { %p468_p8 = por %p467_p7, %p466_p6 }
  0x2f   :  { %p469_p9 = pnand %p468_p8, %p462_p5 }
  0x31   :  { %472 = shalt.err (!%p469_p9)
}
  0x32   :  { %46 = dma.hbm_to_vmem [thread:$0]  %s601_s2, 1024, %s41_s10, [#allocation6], %s502_s28, %s502_s28, %s503_s29  }
  0x33   :  { %495 = dma.done.wait [#allocation3], 128  }
  0x34   :  { %496 = vsyncadd [#allocation3], 4294967168 }
  0x35   :  { %497 = dma.done.wait [#allocation6], 2048  }
  0x36   :  { %498 = vsyncadd [#allocation6], 4294965248  ;;  %v506_v0 = vmov 0.0   ;;  %vm507_vm0 = vmmov 0   ;;  %v391_v1 = vld [vmem:[#allocation5] sm:$0xff]   ;;  %v392_v2 = vld [vmem:[#allocation5 + $0x8] sm:$0xff]  }
  0x37   :  { %343 = vmatprep.subr.bf16.mxu0 %v506_v0  ;;  %359 = vmatprep.mubr.msk.bf16.mxu0 %vm507_vm0, %v506_v0  ;;  %v393_v3 = vld [vmem:[#allocation5 + $0x10] sm:$0xff]   ;;  %v399_v4 = vld [vmem:[#allocation7] sm:$0xff]   ;;  %v394_v5 = vld [vmem:[#allocation5 + $0x18] sm:$0xff]   ;;  %s508_s7 = smov [#allocation8]  }
  0x38   :  { %363 = vmatprep.subr.bf16.mxu1 %v506_v0  ;;  %379 = vmatprep.mubr.msk.bf16.mxu1 %vm507_vm0, %v506_v0  ;;  %v400_v6 = vld [vmem:[#allocation7 + $0x8] sm:$0xff]   ;;  %v395_v7 = vld [vmem:[#allocation5 + $0x20] sm:$0xff]   ;;  %v401_v8 = vld [vmem:[#allocation7 + $0x10] sm:$0xff]   ;;  %s297_s8 = sshll.u32 %s508_s7, 4  ;;  %s298_s8 = int_to_ptr.vmem [resolvable:$true] %s297_s8 }
  0x39   :  { %344 = vmatpush3.bf16.msra.mxu0 %v391_v1  ;;  %364 = vmatpush3.bf16.msra.mxu1 %v399_v4  ;;  %v396_v9 = vld [vmem:[#allocation5 + $0x28] sm:$0xff]   ;;  %v402_v10 = vld [vmem:[#allocation7 + $0x18] sm:$0xff]   ;;  %v397_v11 = vld [vmem:[#allocation5 + $0x30] sm:$0xff]   ;;  %p478_p11 = scmp.lt.s32.totalorder %s298_s8, %s298_s8 }
  0x3a   :  { %345 = vmatprep.subr.bf16.mxu0 %v506_v0  ;;  %365 = vmatprep.subr.bf16.mxu1 %v506_v0  ;;  %v403_v12 = vld [vmem:[#allocation7 + $0x20] sm:$0xff]   ;;  %v398_v13 = vld [vmem:[#allocation5 + $0x38] sm:$0xff]   ;;  %v404_v15 = vld [vmem:[#allocation7 + $0x28] sm:$0xff]  }
  0x3b   :  { %v61_v14 = vld [vmem:[#allocation2] sm:$0xff]  ;;  %v405_v17 = vld [vmem:[#allocation7 + $0x30] sm:$0xff]  }
  0x3c   :  { %v62_v16 = vpack.c.bf16 %v61_v14, %v61_v14  ;;  %v406_v18 = vld [vmem:[#allocation7 + $0x38] sm:$0xff]  }
  0x3d   :  { %346 = vmatpush3.bf16.msra.mxu0 %v392_v2  ;;  %366 = vmatpush3.bf16.msra.mxu1 %v400_v6  ;;  %v307_v19 = vld [vmem:[%s602_s3] ss:$0 sm:$0xff]  ;;  %s473_s3 = scalar_lea.vmem %s298_s8, 128 }
  0x3e   :  { %347 = vmatprep.subr.bf16.mxu0 %v506_v0  ;;  %367 = vmatprep.subr.bf16.mxu1 %v506_v0  ;;  %v316_v28 = vld [vmem:[%s603_s4] ss:$0 sm:$0xff]  ;;  %p474_p10 = scmp.ne.s32.totalorder %s298_s8, %s473_s3  ;;  %p479_p12 = scmp.lt.s32.totalorder %s473_s3, %s473_s3 }
  0x40   :  { %p480_p13 = por %p479_p12, %p478_p11 }
  0x41   :  { %348 = vmatpush3.bf16.msra.mxu0 %v393_v3  ;;  %368 = vmatpush3.bf16.msra.mxu1 %v401_v8 }
  0x42   :  { %349 = vmatprep.subr.bf16.mxu0 %v506_v0  ;;  %369 = vmatprep.subr.bf16.mxu1 %v506_v0  ;;  %p481_p0 = pnand %p480_p13, %p474_p10 }
  0x45   :  { %350 = vmatpush3.bf16.msra.mxu0 %v394_v5  ;;  %370 = vmatpush3.bf16.msra.mxu1 %v402_v10 }
  0x46   :  { %351 = vmatprep.subr.bf16.mxu0 %v506_v0  ;;  %371 = vmatprep.subr.bf16.mxu1 %v506_v0 }
  0x49   :  { %352 = vmatpush3.bf16.msra.mxu0 %v395_v7  ;;  %372 = vmatpush3.bf16.msra.mxu1 %v403_v12 }
  0x4a   :  { %353 = vmatprep.subr.bf16.mxu0 %v506_v0  ;;  %373 = vmatprep.subr.bf16.mxu1 %v506_v0 }
  0x4d   :  { %354 = vmatpush3.bf16.msra.mxu0 %v396_v9  ;;  %374 = vmatpush3.bf16.msra.mxu1 %v404_v15 }
  0x4e   :  { %355 = vmatprep.subr.bf16.mxu0 %v506_v0  ;;  %375 = vmatprep.subr.bf16.mxu1 %v506_v0 }
  0x51   :  { %356 = vmatpush3.bf16.msra.mxu0 %v397_v11  ;;  %376 = vmatpush3.bf16.msra.mxu1 %v405_v17 }
  0x52   :  { %357 = vmatprep.subr.bf16.mxu0 %v506_v0  ;;  %377 = vmatprep.subr.bf16.mxu1 %v506_v0 }
  0x55   :  { %358 = vmatpush3.bf16.msra.mxu0 %v398_v13  ;;  %378 = vmatpush3.bf16.msra.mxu1 %v406_v18 }
  0x58   :  { %360 = vmatmul.mubr.bf16.vlgmr.msra.gmra.mrb[0].mxu0 %v62_v16 }
 0x12b   :  { %v168_v20 = vpop.f32.mrb[0].mxu0 }
 0x12c   :  { %v169_v21 = vadd.f32 %v307_v19, %v168_v20  ;;  %v361_v22 = vpop.f32.mrb[1].mxu0 }
 0x12d   :  { %v171_v23 = vpop.f32.mrb[2].mxu0 }
 0x12e   :  { %v174_v24 = vmul.f32 0.01, %v169_v21  ;;  %v362_v25 = vpop.f32.mrb[3].mxu0 }
 0x130   :  { %v175_v26 = vmax.f32 %v169_v21, %v174_v24 }
 0x132   :  { %v176_v27 = vpack.c.bf16 %v175_v26, %v175_v26 }
 0x134   :  { %380 = vmatmul.mubr.bf16.vlgmr.msra.gmra.mrb[0].mxu1 %v176_v27 }
 0x207   :  { %v282_v29 = vpop.f32.mrb[0].mxu1 }
 0x208   :  { %v283_v30 = vadd.f32 %v316_v28, %v282_v29  ;;  %v381_v31 = vpop.f32.mrb[1].mxu1 }
 0x209   :  { %v285_v32 = vpop.f32.mrb[2].mxu1 }
 0x20a   :  { %v288_v33 = vmul.f32 0.01, %v283_v30  ;;  %v382_v34 = vpop.f32.mrb[3].mxu1 }
 0x20c   :  { %v289_v35 = vmax.f32 %v283_v30, %v288_v33 }
 0x20e   :  { %290 = vst [vmem:[#allocation8] sm:$0xff] %v289_v35 }
 0x20f   :  { %484 = shalt.err (!%p481_p0)
}
 0x210   :  { %s485_s10 = scalar_lea.hbm %s604_s5, 128 }
 0x211   :  { %p486_p1 = scmp.ne.s32.totalorder %s604_s5, %s485_s10  ;;  %p489_p2 = scmp.lt.u32.totalorder %s485_s10, %s604_s5 }
 0x213   :  { %p491_p3 = pnand %p489_p2, %p486_p1 }
 0x215   :  { %494 = shalt.err (!%p491_p3)
}
 0x216   :  { %300 = dma.vmem_to_hbm [thread:$0]  %s298_s8, 128, %s604_s5, [#allocation4]  }
 0x217   :  { %499 = dma.done.wait [#allocation4], 128  }
 0x218   :  { %500 = vsyncadd [#allocation4], 4294967168 }
 0x219   :  { %304 = vsyncpa [#allocation3], 1 }
 0x21a   :  { %305 = vsyncpa [#allocation6], 1 }
 0x21b   :  { %306 = vsyncpa [#allocation4], 1 }

</bundles_post_ra>
